<compile_context>
chip_gen: v5e
topology: v5e:2x2
jax: 0.10.0
libtpu: 0.0.40
codegen_flags: <defaults>
</compile_context>

<pallas_src>
import functools

import jax
import jax.numpy as jnp
from jax.experimental import pallas as pl
from jax.experimental.pallas import tpu as pltpu

EPS = 1e-5


# ---------------------------------------------------------------------------
# Tile selection: largest multiple-of-128 divisor of HW whose (C, TILE_HW)
# f32 tile stays ~2 MiB, so double-buffered in+out tiles fit comfortably
# under every generation's scoped-VMEM default (v5e 16 MiB, v7x 32 MiB).
# ---------------------------------------------------------------------------
def _choose_tile_hw(C, HW):
    if HW % 128 != 0:
        return HW                       # small / irregular: one full block
    budget_elems = (2 * 1024 * 1024) // 4          # ~2 MiB of f32 per tile
    target = max(128, (budget_elems // max(C, 1)) // 128 * 128)
    tile = min(HW, target)
    while tile > 128 and HW % tile != 0:
        tile -= 128
    if tile <= 0 or HW % tile != 0:
        return HW
    return tile


# ---------------------------------------------------------------------------
# Kernel 1: batch-norm statistics (per-channel mean / biased var over N,H,W).
# Grid = (N, HW_tiles); sums accumulate in VMEM scratch across both axes.
# ---------------------------------------------------------------------------
def bn_stats_kernel(x_ref, mean_ref, var_ref, sum_sc, sq_sc, *, count):
    n = pl.program_id(0)
    h = pl.program_id(1)

    @pl.when(jnp.logical_and(n == 0, h == 0))
    def _():
        sum_sc[...] = jnp.zeros_like(sum_sc)
        sq_sc[...] = jnp.zeros_like(sq_sc)

    x = x_ref[0].astype(jnp.float32)                        # (C, TILE_HW)
    sum_sc[...] += jnp.sum(x, axis=1, keepdims=True)        # (C, 1)
    sq_sc[...] += jnp.sum(x * x, axis=1, keepdims=True)     # (C, 1)

    @pl.when(jnp.logical_and(n == pl.num_programs(0) - 1,
                             h == pl.num_programs(1) - 1))
    def _():
        inv_count = jnp.float32(1.0 / count)
        mean = sum_sc[...] * inv_count
        mean_ref[...] = mean
        # biased variance, matching what PyTorch uses for normalization
        var_ref[...] = sq_sc[...] * inv_count - mean * mean


# ---------------------------------------------------------------------------
# Kernel 2: fused epilogue. out_tile = A_n @ x_tile + b_n  (single MXU matmul)
# ---------------------------------------------------------------------------
def cbn_apply_kernel(x_ref, a_ref, b_ref, o_ref):
    x = x_ref[0]                                            # (C, TILE_HW)
    a = a_ref[0]                                            # (C, C)
    out = jnp.dot(a, x, preferred_element_type=jnp.float32) + b_ref[0]
    o_ref[0] = out.astype(o_ref.dtype)


# ---------------------------------------------------------------------------
# Wrapper
# ---------------------------------------------------------------------------
@jax.jit
def cbn_forward(x, condition, wk, wb, conv_w, conv_b):
    N, C, H, W = x.shape
    HW = H * W
    xr = x.reshape(N, C, HW)

    tile_hw = _choose_tile_hw(C, HW)
    n_hw = HW // tile_hw

    # ---- pass 1: batch statistics ----------------------------------------
    stats_kernel = functools.partial(bn_stats_kernel, count=float(N * HW))
    mean, var = pl.pallas_call(
        stats_kernel,
        out_shape=(jax.ShapeDtypeStruct((C, 1), jnp.float32),
                   jax.ShapeDtypeStruct((C, 1), jnp.float32)),
        grid_spec=pltpu.PrefetchScalarGridSpec(
            num_scalar_prefetch=0,
            grid=(N, n_hw),
            in_specs=[pl.BlockSpec((1, C, tile_hw), lambda n, h: (n, 0, h))],
            out_specs=(pl.BlockSpec((C, 1), lambda n, h: (0, 0)),
                       pl.BlockSpec((C, 1), lambda n, h: (0, 0))),
            scratch_shapes=[pltpu.VMEM((C, 1), jnp.float32),
                            pltpu.VMEM((C, 1), jnp.float32)]),
        compiler_params=pltpu.CompilerParams(
            dimension_semantics=("arbitrary", "arbitrary")),
    )(xr)

    # ---- fold BN + conditional affine + 1x1 conv into per-sample A, b -----
    mean_c = mean.reshape(C)
    inv_std = jax.lax.rsqrt(var.reshape(C) + EPS)                    # (C,)
    cond_f = condition.astype(jnp.float32)
    gamma = cond_f @ wk.astype(jnp.float32).T                        # (N, C)
    beta = cond_f @ wb.astype(jnp.float32).T                         # (N, C)
    m = gamma[:, :, None] * jnp.eye(C, dtype=jnp.float32)[None] \
        + conv_w.astype(jnp.float32)[None]                           # (N, C, C)
    a = m * inv_std[None, None, :]                                   # (N, C, C)
    b = beta + conv_b.astype(jnp.float32)[None, :] \
        - jnp.einsum("noc,c->no", a, mean_c)                         # (N, C)
    a = a.astype(x.dtype)               # bf16 MXU operands when x is bf16
    b = b.reshape(N, C, 1)

    # ---- pass 2: out = A_n @ x + b_n, tiled over (N, HW) ------------------
    out = pl.pallas_call(
        cbn_apply_kernel,
        out_shape=jax.ShapeDtypeStruct((N, C, HW), x.dtype),
        grid_spec=pltpu.PrefetchScalarGridSpec(
            num_scalar_prefetch=0,
            grid=(N, n_hw),
            in_specs=[
                pl.BlockSpec((1, C, tile_hw), lambda n, h: (n, 0, h)),  # x
                pl.BlockSpec((1, C, C), lambda n, h: (n, 0, 0)),        # A_n
                pl.BlockSpec((1, C, 1), lambda n, h: (n, 0, 0)),        # b_n
            ],
            out_specs=pl.BlockSpec((1, C, tile_hw), lambda n, h: (n, 0, h))),
        compiler_params=pltpu.CompilerParams(
            dimension_semantics=("parallel", "parallel")),
    )(xr, a, b)

    return out.reshape(N, C, H, W)


# ---------------------------------------------------------------------------
# Pure-JAX reference (mirrors the PyTorch module)
# ---------------------------------------------------------------------------
def cbn_reference(x, condition, wk, wb, conv_w, conv_b):
    mean = jnp.mean(x, axis=(0, 2, 3), keepdims=True)
    var = jnp.var(x, axis=(0, 2, 3), keepdims=True)          # biased
    bn = (x - mean) / jnp.sqrt(var + EPS)
    gamma = condition @ wk.T                                  # (N, C)
    beta = condition @ wb.T                                   # (N, C)
    out_cond = gamma[:, :, None, None] * bn + beta[:, :, None, None]
    out_unc = jnp.einsum("oc,nchw->nohw", conv_w, bn) + conv_b.reshape(1, -1, 1, 1)
    return out_cond + out_unc


if __name__ == "__main__":
    N, C, H, W = 2, 4, 16, 16
    n_class = 13

    key = jax.random.PRNGKey(0)
    kx, kc, k1, k2, k3, k4 = jax.random.split(key, 6)

    x = jax.random.normal(kx, (N, C, H, W), dtype=jnp.float32)
    condition = jax.random.uniform(kc, (N, n_class), dtype=jnp.float32)

    # xavier_uniform for the two condition linears (weight shape (C, n_class))
    bound_lin = (6.0 / (C + n_class)) ** 0.5
    wk = jax.random.uniform(k1, (C, n_class), jnp.float32, -bound_lin, bound_lin)
    wb = jax.random.uniform(k2, (C, n_class), jnp.float32, -bound_lin, bound_lin)

    # Conv2d(C, C, 1) default init: uniform(-1/sqrt(fan_in), 1/sqrt(fan_in))
    bound_conv = 1.0 / (C ** 0.5)
    conv_w = jax.random.uniform(k3, (C, C), jnp.float32, -bound_conv, bound_conv)
    conv_b = jax.random.uniform(k4, (C,), jnp.float32, -bound_conv, bound_conv)

    out = cbn_forward(x, condition, wk, wb, conv_w, conv_b)
    out = jax.block_until_ready(out)

    ref = cbn_reference(x, condition, wk, wb, conv_w, conv_b)
    assert out.shape == (N, C, H, W)
    assert jnp.allclose(out, ref, atol=1e-4, rtol=1e-4), "mismatch vs reference"

    print("KERNEL_OK")
</pallas_src>

<mosaic_0001>
module attributes {stable_mosaic.version = 11 : i64} {
  func.func @bn_stats_kernel(%arg0: i32, %arg1: i32, %arg2: memref<1x4x256xf32, #tpu.memory_space<vmem>>, %arg3: memref<4x1xf32, #tpu.memory_space<vmem>>, %arg4: memref<4x1xf32, #tpu.memory_space<vmem>>, %arg5: memref<4x1xf32, #tpu.memory_space<vmem>>, %arg6: memref<4x1xf32, #tpu.memory_space<vmem>>) attributes {dimension_semantics = [#tpu.dimension_semantics<arbitrary>, #tpu.dimension_semantics<arbitrary>], iteration_bounds = array<i64: 2, 1>, scalar_prefetch = 0 : i64, scratch_operands = 2 : i64, tpu.core_type = #tpu.core_type<tc>, window_params = [{transform_indices = @transform_0, window_bounds = array<i64: 1, 4, 256>}, {pipeline_mode = #tpu.pipeline_mode<synchronous>, transform_indices = @transform_1, window_bounds = array<i64: 4, 1>}, {pipeline_mode = #tpu.pipeline_mode<synchronous>, transform_indices = @transform_2, window_bounds = array<i64: 4, 1>}]} {
    %c0_i32 = arith.constant 0 : i32
    %0 = arith.cmpi eq, %arg0, %c0_i32 : i32
    %c0_i32_0 = arith.constant 0 : i32
    %1 = arith.cmpi eq, %arg1, %c0_i32_0 : i32
    %2 = arith.andi %0, %1 : i1
    %3 = arith.extui %2 : i1 to i32
    %c0_i32_1 = arith.constant 0 : i32
    %4 = arith.cmpi ne, %3, %c0_i32_1 : i32
    scf.if %4 {
      %cst_15 = arith.constant 0.000000e+00 : f32
      %23 = vector.broadcast %cst_15 : f32 to vector<4x1xf32>
      %c0_16 = arith.constant 0 : index
      %c0_17 = arith.constant 0 : index
      %24 = vector.load %arg5[%c0_16, %c0_17] : memref<4x1xf32, #tpu.memory_space<vmem>>, vector<4x1xf32>
      tpu.vector_store %arg5[%c0_16, %c0_17], %23 {strides = array<i32>} : memref<4x1xf32, #tpu.memory_space<vmem>>, vector<4x1xf32>,
      %cst_18 = arith.constant 0.000000e+00 : f32
      %25 = vector.broadcast %cst_18 : f32 to vector<4x1xf32>
      %c0_19 = arith.constant 0 : index
      %c0_20 = arith.constant 0 : index
      %26 = vector.load %arg6[%c0_19, %c0_20] : memref<4x1xf32, #tpu.memory_space<vmem>>, vector<4x1xf32>
      tpu.vector_store %arg6[%c0_19, %c0_20], %25 {strides = array<i32>} : memref<4x1xf32, #tpu.memory_space<vmem>>, vector<4x1xf32>,
    } else {
    }
    %c0 = arith.constant 0 : index
    %c0_2 = arith.constant 0 : index
    %c0_3 = arith.constant 0 : index
    %5 = vector.load %arg2[%c0, %c0_2, %c0_3] : memref<1x4x256xf32, #tpu.memory_space<vmem>>, vector<1x4x256xf32>
    %6 = vector.shape_cast %5 : vector<1x4x256xf32> to vector<4x256xf32>
    %c0_4 = arith.constant 0 : index
    %c0_5 = arith.constant 0 : index
    %7 = vector.load %arg5[%c0_4, %c0_5] : memref<4x1xf32, #tpu.memory_space<vmem>>, vector<4x1xf32>
    %cst = arith.constant dense<0.000000e+00> : vector<4xf32>
    %8 = vector.multi_reduction <add>, %6, %cst [1] : vector<4x256xf32> to vector<4xf32>
    %9 = vector.shape_cast %8 : vector<4xf32> to vector<4x1xf32>
    %10 = arith.addf %7, %9 : vector<4x1xf32>
    %c0_6 = arith.constant 0 : index
    %c0_7 = arith.constant 0 : index
    %11 = vector.load %arg5[%c0_6, %c0_7] : memref<4x1xf32, #tpu.memory_space<vmem>>, vector<4x1xf32>
    tpu.vector_store %arg5[%c0_6, %c0_7], %10 {strides = array<i32>} : memref<4x1xf32, #tpu.memory_space<vmem>>, vector<4x1xf32>,
    %c0_8 = arith.constant 0 : index
    %c0_9 = arith.constant 0 : index
    %12 = vector.load %arg6[%c0_8, %c0_9] : memref<4x1xf32, #tpu.memory_space<vmem>>, vector<4x1xf32>
    %13 = arith.mulf %6, %6 : vector<4x256xf32>
    %cst_10 = arith.constant dense<0.000000e+00> : vector<4xf32>
    %14 = vector.multi_reduction <add>, %13, %cst_10 [1] : vector<4x256xf32> to vector<4xf32>
    %15 = vector.shape_cast %14 : vector<4xf32> to vector<4x1xf32>
    %16 = arith.addf %12, %15 : vector<4x1xf32>
    %c0_11 = arith.constant 0 : index
    %c0_12 = arith.constant 0 : index
    %17 = vector.load %arg6[%c0_11, %c0_12] : memref<4x1xf32, #tpu.memory_space<vmem>>, vector<4x1xf32>
    tpu.vector_store %arg6[%c0_11, %c0_12], %16 {strides = array<i32>} : memref<4x1xf32, #tpu.memory_space<vmem>>, vector<4x1xf32>,
    %c1_i32 = arith.constant 1 : i32
    %18 = arith.cmpi eq, %arg0, %c1_i32 : i32
    %c0_i32_13 = arith.constant 0 : i32
    %19 = arith.cmpi eq, %arg1, %c0_i32_13 : i32
    %20 = arith.andi %18, %19 : i1
    %21 = arith.extui %20 : i1 to i32
    %c0_i32_14 = arith.constant 0 : i32
    %22 = arith.cmpi ne, %21, %c0_i32_14 : i32
    scf.if %22 {
      %c0_15 = arith.constant 0 : index
      %c0_16 = arith.constant 0 : index
      %23 = vector.load %arg5[%c0_15, %c0_16] : memref<4x1xf32, #tpu.memory_space<vmem>>, vector<4x1xf32>
      %cst_17 = arith.constant 0.001953125 : f32
      %24 = vector.broadcast %cst_17 : f32 to vector<4x1xf32>
      %25 = arith.mulf %23, %24 : vector<4x1xf32>
      %c0_18 = arith.constant 0 : index
      %c0_19 = arith.constant 0 : index
      %26 = vector.load %arg3[%c0_18, %c0_19] : memref<4x1xf32, #tpu.memory_space<vmem>>, vector<4x1xf32>
      tpu.vector_store %arg3[%c0_18, %c0_19], %25 {strides = array<i32>} : memref<4x1xf32, #tpu.memory_space<vmem>>, vector<4x1xf32>,
      %c0_20 = arith.constant 0 : index
      %c0_21 = arith.constant 0 : index
      %27 = vector.load %arg6[%c0_20, %c0_21] : memref<4x1xf32, #tpu.memory_space<vmem>>, vector<4x1xf32>
      %cst_22 = arith.constant 0.001953125 : f32
      %28 = vector.broadcast %cst_22 : f32 to vector<4x1xf32>
      %29 = arith.mulf %27, %28 : vector<4x1xf32>
      %30 = arith.mulf %25, %25 : vector<4x1xf32>
      %31 = arith.subf %29, %30 : vector<4x1xf32>
      %c0_23 = arith.constant 0 : index
      %c0_24 = arith.constant 0 : index
      %32 = vector.load %arg4[%c0_23, %c0_24] : memref<4x1xf32, #tpu.memory_space<vmem>>, vector<4x1xf32>
      tpu.vector_store %arg4[%c0_23, %c0_24], %31 {strides = array<i32>} : memref<4x1xf32, #tpu.memory_space<vmem>>, vector<4x1xf32>,
    } else {
    }
    return
  }
  func.func @transform_0(%arg0: i32, %arg1: i32) -> (i32, i32, i32) {
    %c0_i32 = arith.constant 0 : i32
    %c0_i32_0 = arith.constant 0 : i32
    return %arg0, %c0_i32, %arg1 : i32, i32, i32
  }
  func.func @transform_1(%arg0: i32, %arg1: i32) -> (i32, i32) {
    %c0_i32 = arith.constant 0 : i32
    %c0_i32_0 = arith.constant 0 : i32
    %c0_i32_1 = arith.constant 0 : i32
    return %c0_i32, %c0_i32_0 : i32, i32
  }
  func.func @transform_2(%arg0: i32, %arg1: i32) -> (i32, i32) {
    %c0_i32 = arith.constant 0 : i32
    %c0_i32_0 = arith.constant 0 : i32
    %c0_i32_1 = arith.constant 0 : i32
    return %c0_i32, %c0_i32_0 : i32, i32
  }
}

module attributes {stable_mosaic.version = 11 : i64} {
  func.func @cbn_apply_kernel(%arg0: i32, %arg1: i32, %arg2: memref<1x4x256xf32, #tpu.memory_space<vmem>>, %arg3: memref<1x4x4xf32, #tpu.memory_space<vmem>>, %arg4: memref<1x4x1xf32, #tpu.memory_space<vmem>>, %arg5: memref<1x4x256xf32, #tpu.memory_space<vmem>>) attributes {dimension_semantics = [#tpu.dimension_semantics<parallel>, #tpu.dimension_semantics<parallel>], iteration_bounds = array<i64: 2, 1>, scalar_prefetch = 0 : i64, scratch_operands = 0 : i64, tpu.core_type = #tpu.core_type<tc>, window_params = [{transform_indices = @transform_0, window_bounds = array<i64: 1, 4, 256>}, {transform_indices = @transform_1, window_bounds = array<i64: 1, 4, 4>}, {transform_indices = @transform_2, window_bounds = array<i64: 1, 4, 1>}, {transform_indices = @transform_3, window_bounds = array<i64: 1, 4, 256>}]} {
    %c0 = arith.constant 0 : index
    %c0_0 = arith.constant 0 : index
    %c0_1 = arith.constant 0 : index
    %0 = vector.load %arg2[%c0, %c0_0, %c0_1] : memref<1x4x256xf32, #tpu.memory_space<vmem>>, vector<1x4x256xf32>
    %1 = vector.shape_cast %0 : vector<1x4x256xf32> to vector<4x256xf32>
    %c0_2 = arith.constant 0 : index
    %c0_3 = arith.constant 0 : index
    %c0_4 = arith.constant 0 : index
    %2 = vector.load %arg3[%c0_2, %c0_3, %c0_4] : memref<1x4x4xf32, #tpu.memory_space<vmem>>, vector<1x4x4xf32>
    %3 = vector.shape_cast %2 : vector<1x4x4xf32> to vector<4x4xf32>
    %cst = arith.constant dense<0.000000e+00> : vector<4x256xf32>
    %4 = tpu.matmul %3, %1, %cst {dimension_numbers = #tpu.dot_dimension_numbers<[1], [0], [0], [1], [0, 0, 1, 1], [], []>} : vector<4x4xf32>, vector<4x256xf32>, vector<4x256xf32> -> vector<4x256xf32>
    %c0_5 = arith.constant 0 : index
    %c0_6 = arith.constant 0 : index
    %c0_7 = arith.constant 0 : index
    %5 = vector.load %arg4[%c0_5, %c0_6, %c0_7] : memref<1x4x1xf32, #tpu.memory_space<vmem>>, vector<1x4x1xf32>
    %6 = vector.shape_cast %5 : vector<1x4x1xf32> to vector<4x1xf32>
    %7 = vector.broadcast %6 : vector<4x1xf32> to vector<4x256xf32>
    %8 = arith.addf %4, %7 : vector<4x256xf32>
    %c0_8 = arith.constant 0 : index
    %c0_9 = arith.constant 0 : index
    %c0_10 = arith.constant 0 : index
    %9 = vector.load %arg5[%c0_8, %c0_9, %c0_10] : memref<1x4x256xf32, #tpu.memory_space<vmem>>, vector<1x4x256xf32>
    %10 = vector.shape_cast %9 : vector<1x4x256xf32> to vector<4x256xf32>
    %11 = vector.shape_cast %8 : vector<4x256xf32> to vector<1x4x256xf32>
    tpu.vector_store %arg5[%c0_8, %c0_9, %c0_10], %11 {strides = array<i32>} : memref<1x4x256xf32, #tpu.memory_space<vmem>>, vector<1x4x256xf32>,
    return
  }
  func.func @transform_0(%arg0: i32, %arg1: i32) -> (i32, i32, i32) {
    %c0_i32 = arith.constant 0 : i32
    %c0_i32_0 = arith.constant 0 : i32
    return %arg0, %c0_i32, %arg1 : i32, i32, i32
  }
  func.func @transform_1(%arg0: i32, %arg1: i32) -> (i32, i32, i32) {
    %c0_i32 = arith.constant 0 : i32
    %c0_i32_0 = arith.constant 0 : i32
    %c0_i32_1 = arith.constant 0 : i32
    return %arg0, %c0_i32, %c0_i32_0 : i32, i32, i32
  }
  func.func @transform_2(%arg0: i32, %arg1: i32) -> (i32, i32, i32) {
    %c0_i32 = arith.constant 0 : i32
    %c0_i32_0 = arith.constant 0 : i32
    %c0_i32_1 = arith.constant 0 : i32
    return %arg0, %c0_i32, %c0_i32_0 : i32, i32, i32
  }
  func.func @transform_3(%arg0: i32, %arg1: i32) -> (i32, i32, i32) {
    %c0_i32 = arith.constant 0 : i32
    %c0_i32_0 = arith.constant 0 : i32
    return %arg0, %c0_i32, %arg1 : i32, i32, i32
  }
}

</mosaic_0001>

<bundles_post_ra>
// kernel: cbn_forward.2
= control target key start
LH: loop header
LB: loop body
LE: loop exit
PB: predicated region body
PF: predicated region fallthrough
CT: control target
= control target key end

     0   :  { %s335_s9 = smov 0   ;;  %s337_s10 = smov 0   ;;  %s383_s0 = inlined_call_operand.vmem [shape: f32[2,4,256], index: 0, kind: input, shape index: {}]   ;;  %s384_s1 = inlined_call_operand.vmem [shape: f32[4,1], index: 1, kind: output, shape index: {0}]   ;;  %s385_s2 = inlined_call_operand.vmem [shape: f32[4,1], index: 2, kind: output, shape index: {1}]  }
   0x1   :  { %s339_s11 = smov 0  }
   0x2 LB: > { %s25_s12 = sadd.s32 1, %s313_s10  ;;  %p260_p0 = scmp.ge.s32.totalorder %s317_s11, 1  ;;  %s317_s11 = sphi %s339_s11, %s13_s11   ;;  %s313_s10 = sphi %s337_s10, %s387_s10   ;;  %s309_s9 = sphi %s335_s9, %s386_s9  }
   0x3   : > { %p27_p1 = scmp.ge.s32.totalorder %s25_s12, 2  ;;  %p124_p2 = scmp.lt.s32.totalorder %s317_s11, 3 }
   0x5   : > { %s389_s12 = smov (%p27_p1, %s25_s12), 0  ;;  %p125_p3 = pnand %p260_p0, %p124_p2 }
   0x6   : > { %p146_p4 = scmp.lt.s32.totalorder (!%p125_p3), %s309_s9, 1  ;;  %p155_p5 = scmp.eq.s32.totalorder (!%p125_p3), %s309_s9, 0 }
   0x7   : > { %128 = sbr.rel (%p125_p3) target bundleno = 169 (0xa9), region = 24 }
   0xc   : > { %s147_s13 = scalar_select %p146_p4, %s309_s9, 1  ;;  %vm161_vm0 = vcmask (%p155_p5), 3072   ;;  %v319_v0 = vmov (%p155_p5), 0.0  }
   0xd   : > { %160 = sbr.rel (!%p155_p5) target bundleno = 18 (0x12), region = 28  ;;  %162 = vst.msk [vmem:[#allocation2] sm:$0xf] (%p155_p5), %vm161_vm0, %v319_v0 }
   0xe   : > { %s267_s14 = sshll.u32 %s147_s13, 3  ;;  %163 = vst.msk [vmem:[#allocation3] sm:$0xf] (%p155_p5), %vm161_vm0, %v319_v0 }
   0xf   : > { %s153_s17 = scalar_lea.vmem %s383_s0, %s267_s14 }
  0x12 PF: > { %v164_v1 = vld [vmem:[%s153_s17] sm:$0xff]  ;;  %vm172_vm1 = vcmask 1043456   ;;  %p196_p6 = scmp.eq.s32.totalorder %s309_s9, 1  ;;  %vm179_vm2 = vcmask 3072  }
  0x13   : > { %167 = vst [vmem:[#allocation1] ss:$2 sm:$0xff] %v164_v1  ;;  %v182_v2 = vmul.f32 %v164_v1, %v164_v1 }
  0x14   : > { %v165_v13 = vld [vmem:[#allocation2] sm:$0xf] }
  0x15   : > { %v181_v16 = vld [vmem:[#allocation3] sm:$0xf] }
  0x1a   : > { %v168_v3 = vld.sshfl [vmem:[#allocation1] sm:$0xff pattern:$0x75316420]  ;;  %v169_v4 = vld.sshfl [vmem:[#allocation1 + $0x8] sm:$0xff pattern:$0x75316420] }
  0x1b   : > { %v173_v5 = vsel %vm172_vm1, %v168_v3, 0.0  ;;  %v174_v6 = vsel %vm172_vm1, %v169_v4, 0.0  ;;  %184 = vst [vmem:[#allocation1] ss:$2 sm:$0xff] %v182_v2 }
  0x1c   : > { %v175_v7 = vadd.f32 %v174_v6, %v173_v5 }
  0x1e   : > { %176 = vadd.xlane.f32.xlu0 %v175_v7 }
  0x22   : > { %v185_v8 = vld.sshfl [vmem:[#allocation1] sm:$0xff pattern:$0x75316420]  ;;  %v186_v9 = vld.sshfl [vmem:[#allocation1 + $0x8] sm:$0xff pattern:$0x75316420] }
  0x23   : > { %v189_v10 = vsel %vm172_vm1, %v185_v8, 0.0  ;;  %v190_v11 = vsel %vm172_vm1, %v186_v9, 0.0 }
  0x24   : > { %v191_v12 = vadd.f32 %v190_v11, %v189_v10 }
  0x26   : > { %192 = vadd.xlane.f32.xlu0 %v191_v12 }
  0x91   : > { %v177_v14 = vpop.xlane.xlu0 %176 }
  0x92   : > { %v178_v15 = vadd.f32 %v177_v14, %v165_v13 }
  0x94   : > { %180 = vst.msk [vmem:[#allocation2] sm:$0xf] %vm179_vm2, %v178_v15 }
  0x98   : > { %200 = sbr.rel (!%p196_p6) target bundleno = 169 (0xa9), region = 32 }
  0x99   : > { %v193_v17 = vpop.xlane.xlu0 %192 }
  0x9a   : > { %v194_v18 = vadd.f32 %v193_v17, %v181_v16 }
  0x9b   : > { %v201_v19 = vld [vmem:[#allocation2] sm:$0xf] (%p196_p6) }
  0x9c   : > { %195 = vst.msk [vmem:[#allocation3] sm:$0xf] %vm179_vm2, %v194_v18  ;;  %v202_v21 = vmul.f32 (%p196_p6), 0.001953125, %v201_v19 }
  0x9e   : > { %203 = vst.msk [vmem:[%s384_s1] sm:$0xf] %vm179_vm2, %v202_v21  ;;  %v206_v23 = vmul.f32 %v202_v21, %v202_v21 }
  0xa3   : > { %v204_v20 = vld [vmem:[#allocation3] sm:$0xf] }
  0xa4   : > { %v205_v22 = vmul.f32 0.001953125, %v204_v20 }
  0xa6   : > { %v207_v24 = vsub.f32 %v205_v22, %v206_v23 }
  0xa8   : > { %208 = vst.msk [vmem:[%s385_s2] sm:$0xf] %vm179_vm2, %v207_v24 }
  0xa9 PF: > { %s13_s11 = sadd.s32 1, %s317_s11   ;;  %s386_s9 = smov %s313_s10 }
  0xaa   : > { %p10_p7 = scmp.ge.s32.totalorder %s13_s11, 4   ;;  %s387_s10 = smov %s389_s12 }
  0xac   :  { %12 = sbr.rel (!%p10_p7) target bundleno = 2 (0x2), region = 66 }

// kernel: cbn_forward.3
= control target key start
LH: loop header
LB: loop body
LE: loop exit
PB: predicated region body
PF: predicated region fallthrough
CT: control target
= control target key end

     0   :  { %s512_s12 = smov 0   ;;  %s514_s13 = smov 0   ;;  %s554_s0 = inlined_call_operand.vmem [shape: f32[2,4,256], index: 0, kind: input, shape index: {}]   ;;  %s555_s1 = inlined_call_operand.vmem [shape: f32[2,4,4], index: 1, kind: input, shape index: {}]   ;;  %s556_s2 = inlined_call_operand.vmem [shape: f32[2,4,1], index: 2, kind: input, shape index: {}]   ;;  %s557_s3 = inlined_call_operand.vmem [shape: f32[2,4,256], index: 3, kind: output, shape index: {}]  }
   0x1   :  { %s516_s14 = smov 0  }
   0x2 LB: > { %s25_s15 = sadd.s32 1, %s485_s13  ;;  %p426_p0 = scmp.ge.s32.totalorder %s489_s14, 1  ;;  %s489_s14 = sphi %s516_s14, %s13_s14   ;;  %s485_s13 = sphi %s514_s13, %s559_s13   ;;  %s481_s12 = sphi %s512_s12, %s558_s12  }
   0x3   : > { %p27_p1 = scmp.ge.s32.totalorder %s25_s15, 2  ;;  %p176_p2 = scmp.lt.s32.totalorder %s489_s14, 3 }
   0x5   : > { %s561_s15 = smov (%p27_p1, %s25_s15), 0  ;;  %p177_p3 = pnand %p426_p0, %p176_p2 }
   0x6   : > { %p217_p4 = scmp.lt.s32.totalorder (!%p177_p3), %s481_s12, 1 }
   0x7   : > { %180 = sbr.rel (%p177_p3) target bundleno = 157 (0x9d), region = 32 }
   0xc   : > { %v491_v0 = vmov 0   ;;  %s563_s12 = smov (!%p217_p4, %s481_s12), 1  ;;  %vm260_vm0 = vcmask 1043456   ;;  %vm256_vm1 = vcmask 31744  }
   0xd   : > { %466 = vset.pattern.permute.xlu0 %v491_v0  ;;  %s439_s16 = sshll.u32 %s563_s12, 3  ;;  %s429_s20 = sshll.u32 %s563_s12, 2 }
   0xe   : > { %s224_s19 = scalar_lea.vmem %s554_s0, %s439_s16  ;;  %s233_s23 = scalar_lea.vmem %s556_s2, %s429_s20 }
   0xf   : > { %v244_v1 = vld [vmem:[%s224_s19] sm:$0xff]  ;;  %s229_s26 = scalar_lea.vmem %s555_s1, %s429_s20  ;;  %s242_s29 = scalar_lea.vmem %s557_s3, %s439_s16 }
  0x10   : > { %253 = vst [vmem:[#allocation1] ss:$2 sm:$0xff] %v244_v1  ;;  %v246_v2 = vld [vmem:[%s233_s23] sm:$0xf] }
  0x11   : > { %249 = vperm.xlu0 %466, %v246_v2   ;;  %v245_v3 = vld [vmem:[%s229_s26] sm:$0xf] }
  0x17   : > { %v254_v4 = vld.sshfl [vmem:[#allocation1] sm:$0xff pattern:$0x75316420]  ;;  %v255_v5 = vld.sshfl [vmem:[#allocation1 + $0x8] sm:$0xff pattern:$0x75316420] }
  0x18   : > { %433 = vmatpush.msk.msra.mxu0 %vm260_vm0, %v254_v4  ;;  %435 = vmatpush.msk.msra.mxu1 %vm260_vm0, %v255_v5 }
  0x19   : > { %434 = vmatmul.msk.f32.vlgmr.msra.gmra.mxu0 %vm256_vm1, %v245_v3  ;;  %436 = vmatmul.msk.f32.vlgmr.msra.gmra.mxu1 %vm256_vm1, %v245_v3 }
  0x83   : > { %v250_v6 = vpop.permute.xlu0 %249 }
  0x96   : > { %v282_v7 = vpop.f32.mrf.mxu0  ;;  %v302_v8 = vpop.f32.mrf.mxu1 }
  0x97   : > { %v303_v9 = vadd.f32 %v302_v8, %v250_v6  ;;  %v283_v10 = vadd.f32 %v282_v7, %v250_v6 }
  0x99   : > { %v307_v11 = vrot.slane %v303_v9, 4 }
  0x9b   : > { %v308_v12 = vsel %vm260_vm0, %v283_v10, %v307_v11 }
  0x9c   : > { %310 = vst [vmem:[%s242_s29] sm:$0xff] %v308_v12 }
  0x9d PF: > { %s13_s14 = sadd.s32 1, %s489_s14   ;;  %s558_s12 = smov %s485_s13 }
  0x9e   : > { %p10_p5 = scmp.ge.s32.totalorder %s13_s14, 4   ;;  %s559_s13 = smov %s561_s15 }
  0xa0   :  { %12 = sbr.rel (!%p10_p5) target bundleno = 2 (0x2), region = 68 }

</bundles_post_ra>
